<compile_context>
chip_gen: v7x
topology: tpu7x:2x2x1
jax: 0.10.0
libtpu: 0.0.40
codegen_flags: <defaults>
</compile_context>

<pallas_src>
import functools

import jax
import jax.numpy as jnp
from jax.experimental import pallas as pl
from jax.experimental.pallas import tpu as pltpu


def _round_up(x, m):
    return (x + m - 1) // m * m


# ----------------------------------------------------------------------------
# Pallas kernel
# ----------------------------------------------------------------------------

def _padding_features_kernel(x_ref, o_ref, *, scale, fin, fin_aligned):
    """Grid = (row blocks, feature tiles).  All data columns live in feature
    tile j == 0 (tf >= fin by construction); tiles j > 0 are pure zeros."""
    j = pl.program_id(1)

    @pl.when(j == 0)
    def _():
        scaled = (x_ref[...] * scale).astype(o_ref.dtype)      # (tb, fin), VPU
        tb = scaled.shape[0]
        tf = o_ref.shape[-1]
        if tf == fin:
            # No padding inside this tile: single full-width store.
            o_ref[...] = scaled
        elif fin_aligned:
            # fin is lane-aligned: two direct, unmasked lane-dense stores.
            o_ref[:, :fin] = scaled
            o_ref[:, fin:] = jnp.zeros((tb, tf - fin), o_ref.dtype)
        else:
            # Non-aligned fin: build the padded row in-register and do one
            # full-width store (avoids a masked partial store at column fin).
            o_ref[...] = jnp.concatenate(
                [scaled, jnp.zeros((tb, tf - fin), o_ref.dtype)], axis=-1)

    @pl.when(j > 0)
    def _():
        # Pure-zero region: never touches x, no concatenate/vreg work.
        o_ref[...] = jnp.zeros(o_ref.shape, o_ref.dtype)


# ----------------------------------------------------------------------------
# Wrapper
# ----------------------------------------------------------------------------

def padding_features(x, n_features, scale=1.0, *,
                     use_pallas=None,
                     feature_block_lanes=2048,
                     vmem_footprint_bytes=12 << 20):
    """JAX/Pallas equivalent of PaddingFeatures.forward.

    x: (B, fin).  Returns (B, n_features) with out[:, :fin] = scale * x and
    the remaining columns zero.  Integer inputs are promoted to float32
    (matching the torch.zeros(float32) output buffer of the reference).
    """
    B, fin = x.shape
    if fin > n_features:
        raise ValueError(f"fin={fin} must be <= n_features={n_features}")

    out_dtype = x.dtype if jnp.issubdtype(x.dtype, jnp.floating) else jnp.float32
    in_isz = jnp.dtype(x.dtype).itemsize
    out_isz = jnp.dtype(out_dtype).itemsize
    total_bytes = B * fin * in_isz + B * n_features * out_isz

    # Tiny problems: the pallas_call launch/DMA-setup overhead dominates,
    # a fused XLA pad is strictly faster.  (Demo forces the kernel path.)
    if use_pallas is None:
        use_pallas = total_bytes >= (1 << 20)
    if not use_pallas:
        scaled = (x * scale).astype(out_dtype)
        return jnp.pad(scaled, ((0, 0), (0, n_features - fin)))

    # ---- feature tile (lanes) ----------------------------------------------
    fb = max(128, _round_up(int(feature_block_lanes), 128))
    tf_min = min(_round_up(fin, 128), n_features)   # smallest tile holding all data
    if n_features % 128 == 0:
        tf = min(n_features, max(tf_min, fb))       # lane-dense multiple of 128
    else:
        # Keep a single full-width tile; the tail store is masked but correct.
        tf = n_features
    # Invariant: tf >= fin, so every data column lives in feature tile 0.

    # ---- row tile (sublanes), sized by bytes -------------------------------
    sub = max(8, 32 // in_isz)                      # f32 -> 8, bf16 -> 16, int8 -> 32
    per_row_bytes = 2 * (fin * in_isz + tf * out_isz)   # double-buffered in + out
    tb = max(sub, (vmem_footprint_bytes // per_row_bytes) // sub * sub)
    # Keep output blocks ~<= 4 MiB (comfortable on every generation).
    tb = min(tb, max(sub, ((4 << 20) // (tf * out_isz)) // sub * sub))
    # Aim for >= 4 row blocks (>= 2 per TensorCore on v7x) when B permits.
    tb = min(tb, max(sub, _round_up(pl.cdiv(B, 4), sub)))
    # Never larger than the (sublane-rounded) batch.
    tb = min(tb, _round_up(B, sub))

    grid = (pl.cdiv(B, tb), pl.cdiv(n_features, tf))

    kernel = functools.partial(
        _padding_features_kernel,
        scale=float(scale), fin=fin, fin_aligned=(fin % 128 == 0))

    return pl.pallas_call(
        kernel,
        out_shape=jax.ShapeDtypeStruct((B, n_features), out_dtype),
        grid_spec=pltpu.PrefetchScalarGridSpec(
            num_scalar_prefetch=0,
            grid=grid,
            # x's block index is constant in j -> fetched once per row block.
            in_specs=[pl.BlockSpec((tb, fin), lambda i, j: (i, 0))],
            out_specs=pl.BlockSpec((tb, tf), lambda i, j: (i, j)),
        ),
        compiler_params=pltpu.CompilerParams(
            dimension_semantics=("parallel", "arbitrary")),
        cost_estimate=pl.CostEstimate(
            flops=B * fin, transcendentals=0, bytes_accessed=total_bytes),
    )(x)


# ----------------------------------------------------------------------------
# Pure-JAX reference (mirrors the PyTorch forward)
# ----------------------------------------------------------------------------

def _reference_forward(x, n_features, scale=1.0):
    B, fin = x.shape
    out_dtype = x.dtype if jnp.issubdtype(x.dtype, jnp.floating) else jnp.float32
    out = jnp.zeros((B, n_features), dtype=out_dtype)
    return out.at[:, :fin].set((x * scale).astype(out_dtype))


if __name__ == "__main__":
    def _check(y, x, n_features, scale):
        r = _reference_forward(x, n_features, scale)
        assert y.shape == r.shape, (y.shape, r.shape)
        assert jnp.allclose(y, r, rtol=1e-6, atol=1e-6), (
            float(jnp.max(jnp.abs(y - r))))
        assert jnp.all(y[:, x.shape[1]:] == 0.0)

    # Case 1: fin not lane-aligned (concatenate path), single feature tile.
    B1, fin1, nf1, s1 = 16, 32, 128, 0.5
    x1 = jax.random.normal(jax.random.PRNGKey(0), (B1, fin1), dtype=jnp.float32)
    y1 = jax.block_until_ready(padding_features(x1, nf1, s1, use_pallas=True))
    _check(y1, x1, nf1, s1)

    # Case 2: lane-aligned fin, multiple feature tiles (two-store data tile +
    # pure-zero tile), ragged last row block (B=20, tb=8) with no wrapper pad.
    B2, fin2, nf2, s2 = 20, 128, 512, 1.25
    x2 = jax.random.normal(jax.random.PRNGKey(1), (B2, fin2), dtype=jnp.float32)
    y2 = jax.block_until_ready(
        padding_features(x2, nf2, s2, use_pallas=True, feature_block_lanes=256))
    _check(y2, x2, nf2, s2)

    # Case 3: no padding at all (fin == n_features), direct full-width store.
    B3, fin3, nf3, s3 = 8, 128, 128, 2.0
    x3 = jax.random.normal(jax.random.PRNGKey(2), (B3, fin3), dtype=jnp.float32)
    y3 = jax.block_until_ready(padding_features(x3, nf3, s3, use_pallas=True))
    _check(y3, x3, nf3, s3)

    print("KERNEL_OK")
</pallas_src>

<mosaic_0001>
module attributes {stable_mosaic.version = 11 : i64} {
  func.func @_padding_features_kernel(%arg0: i32, %arg1: i32, %arg2: memref<8x32xf32, #tpu.memory_space<vmem>>, %arg3: memref<8x128xf32, #tpu.memory_space<vmem>>) attributes {dimension_semantics = [#tpu.dimension_semantics<parallel>, #tpu.dimension_semantics<arbitrary>], iteration_bounds = array<i64: 2, 1>, scalar_prefetch = 0 : i64, scratch_operands = 0 : i64, tpu.core_type = #tpu.core_type<tc>, window_params = [{transform_indices = @transform_0, window_bounds = array<i64: 8, 32>}, {transform_indices = @transform_1, window_bounds = array<i64: 8, 128>}]} {
    %c0_i32 = arith.constant 0 : i32
    %0 = arith.cmpi eq, %arg1, %c0_i32 : i32
    %1 = arith.extui %0 : i1 to i32
    %c0_i32_0 = arith.constant 0 : i32
    %2 = arith.cmpi ne, %1, %c0_i32_0 : i32
    scf.if %2 {
      %c0 = arith.constant 0 : index
      %c0_3 = arith.constant 0 : index
      %6 = vector.load %arg2[%c0, %c0_3] : memref<8x32xf32, #tpu.memory_space<vmem>>, vector<8x32xf32>
      %cst = arith.constant 5.000000e-01 : f32
      %7 = vector.broadcast %cst : f32 to vector<8x32xf32>
      %8 = arith.mulf %6, %7 : vector<8x32xf32>
      %cst_4 = arith.constant 0.000000e+00 : f32
      %9 = vector.broadcast %cst_4 : f32 to vector<8x96xf32>
      %10 = tpu.concatenate %8, %9 in 1 : vector<8x32xf32>, vector<8x96xf32> -> vector<8x128xf32>
      %c0_5 = arith.constant 0 : index
      %c0_6 = arith.constant 0 : index
      %11 = vector.load %arg3[%c0_5, %c0_6] : memref<8x128xf32, #tpu.memory_space<vmem>>, vector<8x128xf32>
      tpu.vector_store %arg3[%c0_5, %c0_6], %10 {strides = array<i32>} : memref<8x128xf32, #tpu.memory_space<vmem>>, vector<8x128xf32>,
    } else {
    }
    %c0_i32_1 = arith.constant 0 : i32
    %3 = arith.cmpi sgt, %arg1, %c0_i32_1 : i32
    %4 = arith.extui %3 : i1 to i32
    %c0_i32_2 = arith.constant 0 : i32
    %5 = arith.cmpi ne, %4, %c0_i32_2 : i32
    scf.if %5 {
      %cst = arith.constant 0.000000e+00 : f32
      %6 = vector.broadcast %cst : f32 to vector<8x128xf32>
      %c0 = arith.constant 0 : index
      %c0_3 = arith.constant 0 : index
      %7 = vector.load %arg3[%c0, %c0_3] : memref<8x128xf32, #tpu.memory_space<vmem>>, vector<8x128xf32>
      tpu.vector_store %arg3[%c0, %c0_3], %6 {strides = array<i32>} : memref<8x128xf32, #tpu.memory_space<vmem>>, vector<8x128xf32>,
    } else {
    }
    return
  }
  func.func @transform_0(%arg0: i32, %arg1: i32) -> (i32, i32) {
    %c0_i32 = arith.constant 0 : i32
    %c0_i32_0 = arith.constant 0 : i32
    return %arg0, %c0_i32 : i32, i32
  }
  func.func @transform_1(%arg0: i32, %arg1: i32) -> (i32, i32) {
    %c0_i32 = arith.constant 0 : i32
    return %arg0, %arg1 : i32, i32
  }
}

</mosaic_0001>

<bundles_post_ra>
// kernel: tpu_custom_call.1
= control target key start
LH: loop header
LB: loop body
LE: loop exit
PB: predicated region body
PF: predicated region fallthrough
CT: control target
= control target key end

     0   :  { %6 = vsyncpa [#allocation3], 0  ;;  %s627_s0 = inlined_call_operand.hbm [shape: f32[16,32], index: 0, kind: input, shape index: {}]   ;;  %s628_s1 = inlined_call_operand.hbm [shape: f32[16,128], index: 1, kind: output, shape index: {}]  }
   0x1   :  { %8 = vsyncpa [#allocation3 + $0x1], 0 }
   0x2   :  { %9 = vsyncpa [#allocation4], 0 }
   0x3   :  { %11 = vsyncpa [#allocation4 + $0x1], 0  ;;  %s455_s6 = smov 0   ;;  %s457_s7 = smov 0  }
   0x4   :  { %s459_s8 = smov 0   ;;  %s461_s9 = smov 0  }
   0x5   :  { %s463_s10 = smov 0   ;;  %s465_s11 = smov 0  }
   0x6 LB: > { %s254_s12 = sadd.s32 4294967295, %s441_s11   ;;  %s255_s13 = sadd.s32 4294967294, %s441_s11   ;;  %s441_s11 = sphi %s465_s11, %s17_s11   ;;  %s437_s10 = sphi %s463_s10, %s644_s10   ;;  %s433_s9 = sphi %s461_s9, %s643_s9   ;;  %s429_s8 = sphi %s459_s8, %s642_s8   ;;  %s425_s7 = sphi %s457_s7, %s641_s7   ;;  %s421_s6 = sphi %s455_s6, %s640_s6  }
   0x7   : > { %s29_s14 = sadd.s32 1, %s437_s10  ;;  %s36_s15 = sadd.s32 1, %s429_s8 }
   0x8   : > { %p31_p0 = scmp.ge.s32.totalorder %s29_s14, 2  ;;  %p43_p1 = scmp.ne.s32.totalorder %s429_s8, %s425_s7 }
   0x9   : > { %p44_p2 = scmp.eq.s32.totalorder %s441_s11, 0  ;;  %p49_p3 = scmp.ne.s32.totalorder %s425_s7, %s421_s6 }
   0xa   : > { %s646_s14 = smov (%p31_p0, %s29_s14), 0  ;;  %p50_p5 = scmp.eq.s32.totalorder %s254_s12, 0 }
   0xb   : > { %p496_p4 = por %p44_p2, %p43_p1  ;;  %s33_s17 = ssub.s32 %s437_s10, %s646_s14 }
   0xc   : > { %p75_p6 = scmp.eq.s32.totalorder %s254_s12, 1  ;;  %p34_p7 = scmp.eq.s32.totalorder %s33_s17, 0 }
   0xd   : > { %p502_p8 = por %p50_p5, %p49_p3  ;;  %p81_p10 = scmp.eq.s32.totalorder %s255_s13, 1 }
   0xe   : > { %p506_p9 = por %p75_p6, %p43_p1  ;;  %p279_p13 = scmp.lt.s32.totalorder %s441_s11, 2 }
   0xf   : > { %s511_s20 = scalar_select %p34_p7, %s429_s8, %s36_s15  }
  0x10   : > { %s632_s19 = scalar_select %p506_p9, 1, 0 }
  0x11   : > { %p513_p11 = por %p81_p10, %p49_p3  ;;  %s101_s22 = sand.u32 1, %s429_s8  }
  0x12   : > { %s258_s23 = sshll.u32 %s101_s22, 3  ;;  %s259_s24 = sshll.u32 %s437_s10, 7 }
  0x13   : > { %s633_s21 = scalar_select %p513_p11, 1, 0 }
  0x14   : > { %s524_s27 = scalar_lea.hbm %s627_s0, %s259_s24  ;;  %s105_s28 = scalar_lea.vmem [#allocation2], %s258_s23 }
  0x15   : > { %s112_s29 = sshll.u32 %s105_s28, 4  ;;  %p530_p0 = pnand %p279_p13, %p496_p4  ;;  %s526_s29 = int_to_ptr.vmem [resolvable:$true] %s112_s29 }
  0x16   : > { %s102_s2 = scalar_lea.sflag [#allocation3], %s101_s22  ;;  %s329_s3 = scalar_lea.hbm %s524_s27, 128 }
  0x17   : > { %p330_p3 = scmp.ne.s32.totalorder %s524_s27, %s329_s3  ;;  %p331_p5 = pneg %p530_p0 }
  0x18   : > { %s334_s12 = scalar_lea.hbm %s627_s0, 256  ;;  %p335_p4 = scmp.lt.u32.totalorder %s524_s27, %s627_s0 }
  0x19   : > { %p332_p6 = pnand %p331_p5, %p330_p3  ;;  %p336_p10 = scmp.lt.u32.totalorder %s334_s12, %s329_s3 }
  0x1a   : > { %p338_p12 = scmp.lt.u32.totalorder %s329_s3, %s524_s27 }
  0x1b   : > { %p333_p7 = pneg %p332_p6  ;;  %p337_p13 = por %p336_p10, %p335_p4 }
  0x1d   : > { %p339_p1 = por %p338_p12, %p337_p13 }
  0x1f   : > { %p340_p2 = pnand %p339_p1, %p333_p7 }
  0x21   : > { %343 = shalt.err (!%p340_p2)
}
  0x22   : > { %s344_s16 = scalar_lea.vmem %s526_s29, 128  ;;  %s443_s17 = smov [#allocation2]  }
  0x23   : > { %p345_p3 = scmp.ne.s32.totalorder %s526_s29, %s344_s16  ;;  %s349_s22 = sshll.u32 %s443_s17, 4  ;;  %s350_s22 = int_to_ptr.vmem [resolvable:$false] %s349_s22 }
  0x24   : > { %s351_s23 = scalar_lea.vmem %s350_s22, 256  ;;  %p352_p9 = scmp.lt.s32.totalorder %s526_s29, %s350_s22 }
  0x25   : > { %p347_p6 = pnand %p345_p3, %p331_p5  ;;  %p353_p4 = scmp.lt.s32.totalorder %s351_s23, %s344_s16 }
  0x27   : > { %p348_p11 = pneg %p347_p6  ;;  %p354_p10 = por %p353_p4, %p352_p9 }
  0x29   : > { %p355_p12 = pnand %p354_p10, %p348_p11 }
  0x2b   : > { %358 = shalt.err (!%p355_p12)
}
  0x2c   : > { %274 = dma.hbm_to_vmem [thread:$0]  (!%p530_p0), %s524_s27, 128, %s526_s29, %s102_s2  }
  0x2d   : > { %p635_p1 = scmp.lt.s32.totalorder %s441_s11, 3  ;;  %p636_p2 = scmp.ge.s32.totalorder %s441_s11, 1 }
  0x2f   : > { %p118_p5 = pnand %p636_p2, %p635_p1 }
  0x30   : > { %s566_s24 = sand.u32 (!%p118_p5), 1, %s425_s7  }
  0x31   : > { %121 = sbr.rel (%p118_p5) target bundleno = 83 (0x53), region = 24  ;;  %s261_s25 = sshll.u32 (!%p118_p5), %s566_s24, 3 }
  0x32   : > { %s124_s26 = scalar_lea.sflag (!%p118_p5), [#allocation3], %s566_s24  ;;  %s127_s28 = scalar_lea.vmem (!%p118_p5), [#allocation2], %s261_s25 }
  0x38   : > { %412 = dma.done.wait (%p502_p8), %s124_s26, 128  }
  0x39   : > { %414 = vsyncadd (%p502_p8), %s124_s26, 4294967168  ;;  %s145_s27 = scalar_lea.vmem [#allocation5], %s261_s25  ;;  %s264_s30 = sshll.u32 %s433_s9, 7  ;;  %v150_v0 = vld [vmem:[%s127_s28] sm:$0xff]  ;;  %vm152_vm0 = vcmask 261120  }
  0x3a   : > { %s175_s29 = sshll.u32 %s145_s27, 4  ;;  %v151_v1 = vmul.f32 0.5, %v150_v0  ;;  %s580_s4 = scalar_lea.hbm %s628_s1, %s264_s30  ;;  %s575_s29 = int_to_ptr.vmem [resolvable:$true] %s175_s29 }
  0x3b   : > { %s161_s18 = scalar_lea.sflag [#allocation4], %s566_s24  ;;  %s359_s5 = scalar_lea.vmem %s575_s29, 128 }
  0x3c   : > { %v153_v2 = vsel %vm152_vm0, %v151_v1, 0.0  ;;  %p360_p8 = scmp.ne.s32.totalorder %s575_s29, %s359_s5  ;;  %p637_p9 = scmp.ne.s32.totalorder %s632_s19, 0 }
  0x3d   : > { %154 = vst [vmem:[%s145_s27] sm:$0xff] %v153_v2  ;;  %s444_s9 = smov [#allocation5]  }
  0x3e   : > { %p361_p11 = pnand %p360_p8, %p637_p9  ;;  %s363_s12 = sshll.u32 %s444_s9, 4  ;;  %s364_s12 = int_to_ptr.vmem [resolvable:$false] %s363_s12 }
  0x3f   : > { %s365_s13 = scalar_lea.vmem %s364_s12, 256  ;;  %p366_p7 = scmp.lt.s32.totalorder %s575_s29, %s364_s12 }
  0x40   : > { %p362_p0 = pneg %p361_p11  ;;  %p367_p13 = scmp.lt.s32.totalorder %s365_s13, %s359_s5 }
  0x42   : > { %p368_p3 = por %p367_p13, %p366_p7 }
  0x44   : > { %p369_p6 = pnand %p368_p3, %p362_p0 }
  0x46   : > { %372 = shalt.err (!%p369_p6)
}
  0x47   : > { %s373_s15 = scalar_lea.hbm %s580_s4, 128  ;;  %s377_s22 = scalar_lea.hbm %s628_s1, 256 }
  0x48   : > { %p374_p4 = scmp.ne.s32.totalorder %s580_s4, %s373_s15  ;;  %p378_p1 = scmp.lt.u32.totalorder %s580_s4, %s628_s1 }
  0x49   : > { %p379_p2 = scmp.lt.u32.totalorder %s377_s22, %s373_s15  ;;  %p381_p8 = scmp.lt.u32.totalorder %s373_s15, %s580_s4 }
  0x4a   : > { %p375_p10 = pnand %p374_p4, %p637_p9 }
  0x4b   : > { %p380_p5 = por %p379_p2, %p378_p1 }
  0x4c   : > { %p376_p12 = pneg %p375_p10 }
  0x4d   : > { %p382_p11 = por %p381_p8, %p380_p5 }
  0x4f   : > { %p383_p0 = pnand %p382_p11, %p376_p12 }
  0x51   : > { %386 = shalt.err (!%p383_p0)
}
  0x52   : > { %269 = dma.vmem_to_hbm [thread:$0]  (%p637_p9), %s575_s29, 128, %s580_s4, %s161_s18  }
  0x53 PF: > { %s187_s25 = sand.u32 1, %s421_s6   ;;  %p638_p7 = scmp.ne.s32.totalorder %s633_s21, 0 }
  0x54   : > { %p639_p13 = scmp.ge.s32.totalorder %s441_s11, 2  ;;  %s188_s26 = scalar_lea.sflag [#allocation4], %s187_s25 }
  0x56   : > { %p276_p3 = pnand %p639_p13, %p638_p7 }
  0x58   : > { %416 = dma.done.wait (!%p276_p3), %s188_s26, 128  }
  0x59   : > { %418 = vsyncadd (!%p276_p3), %s188_s26, 4294967168  ;;  %s17_s11 = sadd.s32 1, %s441_s11   ;;  %s640_s6 = smov %s425_s7 }
  0x5a   : > { %p14_p6 = scmp.ge.s32.totalorder %s17_s11, 4   ;;  %s641_s7 = smov %s429_s8 }
  0x5b   : > { %s642_s8 = smov %s511_s20  ;;  %s643_s9 = smov %s437_s10 }
  0x5c   : > { %s644_s10 = smov %s646_s14  ;;  %16 = sbr.rel (!%p14_p6) target bundleno = 6 (0x6), region = 77 }
  0x63   :  { %193 = vsyncpa [#allocation3], 1 }
  0x64   :  { %195 = vsyncpa [#allocation3 + $0x1], 1 }
  0x65   :  { %196 = vsyncpa [#allocation4], 1 }
  0x66   :  { %198 = vsyncpa [#allocation4 + $0x1], 1 }

</bundles_post_ra>
